<compile_context>
chip_gen: v5e
topology: v5e:2x2
jax: 0.10.0
libtpu: 0.0.40
codegen_flags: <defaults>
</compile_context>

<pallas_src>
import functools

import jax
import jax.numpy as jnp
from jax import lax
from jax.experimental import pallas as pl
from jax.experimental.pallas import tpu as pltpu


def _bilinear_kernel(*refs, has_bias, activation):
    # refs: xi (tm, D), xj (tn, D), W (D, D), [bias (1, tn)], out (tm, tn),
    #       h scratch (tm, D) in compute dtype.
    if has_bias:
        xi_ref, xj_ref, w_ref, b_ref, o_ref, h_ref = refs
    else:
        xi_ref, xj_ref, w_ref, o_ref, h_ref = refs
        b_ref = None

    # Hoist H_i = x_i @ W: compute once per i-block (only when j == 0) and reuse
    # it across all j tiles of this row-block.
    @pl.when(pl.program_id(1) == 0)
    def _():
        h_ref[...] = jnp.dot(
            xi_ref[...], w_ref[...], preferred_element_type=jnp.float32
        ).astype(h_ref.dtype)

    # Second matmul: contract last dims of H_i (tm, D) and x_j (tn, D) -> (tm, tn).
    # dot_general lets Mosaic fold the "transpose" into the MXU operand feed.
    out = lax.dot_general(
        h_ref[...],
        xj_ref[...],
        dimension_numbers=(((1,), (1,)), ((), ())),
        preferred_element_type=jnp.float32,
    )

    # Fused epilogue on the already-resident tile (free VPU filler).
    if b_ref is not None:
        out = out + b_ref[...].astype(jnp.float32)
    if activation is not None:
        out = activation(out)
    o_ref[...] = out.astype(o_ref.dtype)


def _pick_tile(n, requested, align):
    """Largest tile <= requested that divides n and is `align`-aligned.

    Falls back to the full extent (always a legal block) if no aligned divisor
    exists.
    """
    t = min(requested, n)
    if t == n or n % t == 0 and t % align == 0:
        return t
    t = (t // align) * align
    while t >= align:
        if n % t == 0:
            return t
        t -= align
    return n


@functools.partial(
    jax.jit,
    static_argnames=("tm", "tn", "compute_dtype", "out_dtype", "activation"),
)
def bilinear_pallas(
    x,
    kernel,
    bias=None,
    *,
    tm=256,
    tn=256,
    compute_dtype=None,
    out_dtype=jnp.float32,
    activation=None,
):
    """activation(x @ kernel @ x^T + bias) with a tiled Pallas TPU kernel.

    x:      [N, D]  (dropout already applied — both matmul operands are the
            dropped x, matching the module's forward)
    kernel: [D, D]
    bias:   optional [D] added to the last axis of the [N, N] output (as in the
            module, only meaningful when N == adj_dim)
    compute_dtype: dtype fed to the MXU (e.g. jnp.bfloat16); accumulation is f32.
    """
    N, D = x.shape
    assert kernel.shape == (D, D)
    if compute_dtype is None:
        compute_dtype = x.dtype

    # Lane-dense output tiles: tn aligned to 128 lanes, tm to 8 sublanes
    # (or the full extent for small problems — always a legal block).
    tm = _pick_tile(N, tm, 8)
    tn = _pick_tile(N, tn, 128)

    x_c = x.astype(compute_dtype)
    w_c = kernel.astype(compute_dtype)

    grid = (N // tm, N // tn)
    in_specs = [
        pl.BlockSpec((tm, D), lambda i, j: (i, 0)),  # x rows for the i-block
        pl.BlockSpec((tn, D), lambda i, j: (j, 0)),  # x rows for the j-block
        pl.BlockSpec((D, D), lambda i, j: (0, 0)),   # full W, resident in VMEM
        # TODO(synk): for very large D (W no longer fitting VMEM), add a K grid
        # axis tiling W with an f32 accumulator instead of keeping W resident.
    ]
    args = [x_c, x_c, w_c]
    has_bias = bias is not None
    if has_bias:
        b2 = bias.reshape(1, -1).astype(jnp.float32)
        in_specs.append(pl.BlockSpec((1, tn), lambda i, j: (0, j)))
        args.append(b2)

    cbytes = jnp.dtype(compute_dtype).itemsize
    obytes = jnp.dtype(out_dtype).itemsize

    # Advisory cost hint for XLA's scheduler around the custom call.
    flops = 2 * N * D * D + 2 * N * N * D
    bytes_accessed = 2 * N * D * cbytes + D * D * cbytes + N * N * obytes
    cost = pl.CostEstimate(
        flops=flops, transcendentals=0, bytes_accessed=bytes_accessed
    )

    # Rough VMEM budget: double-buffered xi/xj blocks + double-buffered W +
    # double-buffered out tile + H scratch (+ bias).  Only raise the scoped
    # limit when the default would be too small, so small configs stay portable.
    vmem_est = (
        2 * (tm + tn) * D * cbytes
        + 2 * D * D * cbytes
        + 2 * tm * tn * obytes
        + tm * D * cbytes
        + (2 * tn * 4 if has_bias else 0)
    )
    compiler_kwargs = dict(dimension_semantics=("parallel", "arbitrary"))
    if vmem_est > 24 * 1024 * 1024:
        compiler_kwargs["vmem_limit_bytes"] = int(vmem_est * 1.25)

    kernel_fn = functools.partial(
        _bilinear_kernel, has_bias=has_bias, activation=activation
    )

    return pl.pallas_call(
        kernel_fn,
        out_shape=jax.ShapeDtypeStruct((N, N), out_dtype),
        grid_spec=pltpu.PrefetchScalarGridSpec(
            num_scalar_prefetch=0,
            grid=grid,
            in_specs=in_specs,
            out_specs=pl.BlockSpec((tm, tn), lambda i, j: (i, j)),
            # H_i carry across the j axis, kept in the MXU compute dtype.
            scratch_shapes=[pltpu.VMEM((tm, D), jnp.dtype(compute_dtype))],
        ),
        compiler_params=pltpu.CompilerParams(**compiler_kwargs),
        cost_estimate=cost,
    )(*args)


def glorot_uniform(key, shape, dtype=jnp.float32):
    fan_in, fan_out = shape[0], shape[1]
    limit = jnp.sqrt(6.0 / (fan_in + fan_out))
    return jax.random.uniform(key, shape, dtype, minval=-limit, maxval=limit)


def apply_dropout(x, p, key):
    """F.dropout with training=True: drop with prob p, scale kept by 1/(1-p)."""
    if p <= 0.0 or key is None:
        return x
    keep = jax.random.bernoulli(key, 1.0 - p, x.shape)
    return jnp.where(keep, x / (1.0 - p), 0.0).astype(x.dtype)


def bilinear_forward(
    x,
    kernel,
    *,
    dropout_p=0.2,
    dropout_key=None,
    bias=None,
    activation=None,
    **kw,
):
    """Full module semantics: dropout -> x W x^T (+ bias) (-> activation)."""
    # TODO(synk): dropout stays JAX-side — an in-kernel pltpu.prng_random_bits
    # mask would have to be bit-identical for the xi and xj views of the same rows.
    x = apply_dropout(x, dropout_p, dropout_key)
    return bilinear_pallas(x, kernel, bias, activation=activation, **kw)


if __name__ == "__main__":
    key = jax.random.PRNGKey(0)
    k_x, k_w, k_b, k_drop, k_x2 = jax.random.split(key, 5)

    # --- Test 1: module defaults (use_bias=False, activation=None, dropout=0.2)
    # N=16 nodes, adj_dim=32 features.  Apply dropout once here so the Pallas
    # path and the pure-JAX reference see bit-identical inputs.
    N, adj_dim = 16, 32
    x = jax.random.normal(k_x, (N, adj_dim), dtype=jnp.float32)
    kernel = glorot_uniform(k_w, (adj_dim, adj_dim))

    x_d = apply_dropout(x, 0.2, k_drop)
    out = bilinear_forward(x_d, kernel, dropout_p=0.0)
    out = jax.block_until_ready(out)
    ref = x_d @ kernel @ x_d.T
    assert out.shape == (N, N)
    assert jnp.allclose(out, ref, atol=1e-4, rtol=1e-4)

    # --- Test 2: fused bias + activation epilogue (use_bias=True, 'relu').
    # Bias is [adj_dim] as in the module, so use N == adj_dim here.
    N2 = adj_dim
    x2 = jax.random.normal(k_x2, (N2, adj_dim), dtype=jnp.float32)
    bias = jax.random.normal(k_b, (adj_dim,), dtype=jnp.float32)
    out2 = bilinear_forward(
        x2, kernel, dropout_p=0.0, bias=bias, activation=jax.nn.relu
    )
    out2 = jax.block_until_ready(out2)
    ref2 = jax.nn.relu(x2 @ kernel @ x2.T + bias)
    assert out2.shape == (N2, N2)
    assert jnp.allclose(out2, ref2, atol=1e-4, rtol=1e-4)

    print("KERNEL_OK")
</pallas_src>

<mosaic_0001>
module attributes {stable_mosaic.version = 11 : i64} {
  func.func @_bilinear_kernel(%arg0: i32, %arg1: i32, %arg2: memref<16x32xf32, #tpu.memory_space<vmem>>, %arg3: memref<16x32xf32, #tpu.memory_space<vmem>>, %arg4: memref<32x32xf32, #tpu.memory_space<vmem>>, %arg5: memref<16x16xf32, #tpu.memory_space<vmem>>, %arg6: memref<16x32xf32, #tpu.memory_space<vmem>>) attributes {dimension_semantics = [#tpu.dimension_semantics<parallel>, #tpu.dimension_semantics<arbitrary>], iteration_bounds = array<i64: 1, 1>, scalar_prefetch = 0 : i64, scratch_operands = 1 : i64, tpu.core_type = #tpu.core_type<tc>, window_params = [{transform_indices = @transform_0, window_bounds = array<i64: 16, 32>}, {transform_indices = @transform_1, window_bounds = array<i64: 16, 32>}, {pipeline_mode = #tpu.pipeline_mode<synchronous>, transform_indices = @transform_2, window_bounds = array<i64: 32, 32>}, {transform_indices = @transform_3, window_bounds = array<i64: 16, 16>}]} {
    %c0_i32 = arith.constant 0 : i32
    %0 = arith.cmpi eq, %arg1, %c0_i32 : i32
    %1 = arith.extui %0 : i1 to i32
    %c0_i32_0 = arith.constant 0 : i32
    %2 = arith.cmpi ne, %1, %c0_i32_0 : i32
    scf.if %2 {
      %c0_6 = arith.constant 0 : index
      %c0_7 = arith.constant 0 : index
      %7 = vector.load %arg2[%c0_6, %c0_7] : memref<16x32xf32, #tpu.memory_space<vmem>>, vector<16x32xf32>
      %c0_8 = arith.constant 0 : index
      %c0_9 = arith.constant 0 : index
      %8 = vector.load %arg4[%c0_8, %c0_9] : memref<32x32xf32, #tpu.memory_space<vmem>>, vector<32x32xf32>
      %cst_10 = arith.constant dense<0.000000e+00> : vector<16x32xf32>
      %9 = tpu.matmul %7, %8, %cst_10 {dimension_numbers = #tpu.dot_dimension_numbers<[1], [0], [0], [1], [0, 0, 1, 1], [], []>} : vector<16x32xf32>, vector<32x32xf32>, vector<16x32xf32> -> vector<16x32xf32>
      %c0_11 = arith.constant 0 : index
      %c0_12 = arith.constant 0 : index
      %10 = vector.load %arg6[%c0_11, %c0_12] : memref<16x32xf32, #tpu.memory_space<vmem>>, vector<16x32xf32>
      tpu.vector_store %arg6[%c0_11, %c0_12], %9 {strides = array<i32>} : memref<16x32xf32, #tpu.memory_space<vmem>>, vector<16x32xf32>,
    } else {
    }
    %c0 = arith.constant 0 : index
    %c0_1 = arith.constant 0 : index
    %3 = vector.load %arg6[%c0, %c0_1] : memref<16x32xf32, #tpu.memory_space<vmem>>, vector<16x32xf32>
    %c0_2 = arith.constant 0 : index
    %c0_3 = arith.constant 0 : index
    %4 = vector.load %arg3[%c0_2, %c0_3] : memref<16x32xf32, #tpu.memory_space<vmem>>, vector<16x32xf32>
    %cst = arith.constant dense<0.000000e+00> : vector<16x16xf32>
    %5 = tpu.matmul %3, %4, %cst {dimension_numbers = #tpu.dot_dimension_numbers<[1], [1], [0], [0], [0, 0, 1, 0], [], []>} : vector<16x32xf32>, vector<16x32xf32>, vector<16x16xf32> -> vector<16x16xf32>
    %c0_4 = arith.constant 0 : index
    %c0_5 = arith.constant 0 : index
    %6 = vector.load %arg5[%c0_4, %c0_5] : memref<16x16xf32, #tpu.memory_space<vmem>>, vector<16x16xf32>
    tpu.vector_store %arg5[%c0_4, %c0_5], %5 {strides = array<i32>} : memref<16x16xf32, #tpu.memory_space<vmem>>, vector<16x16xf32>,
    return
  }
  func.func @transform_0(%arg0: i32, %arg1: i32) -> (i32, i32) {
    %c0_i32 = arith.constant 0 : i32
    %c0_i32_0 = arith.constant 0 : i32
    return %arg0, %c0_i32 : i32, i32
  }
  func.func @transform_1(%arg0: i32, %arg1: i32) -> (i32, i32) {
    %c0_i32 = arith.constant 0 : i32
    %c0_i32_0 = arith.constant 0 : i32
    return %arg1, %c0_i32 : i32, i32
  }
  func.func @transform_2(%arg0: i32, %arg1: i32) -> (i32, i32) {
    %c0_i32 = arith.constant 0 : i32
    %c0_i32_0 = arith.constant 0 : i32
    %c0_i32_1 = arith.constant 0 : i32
    return %c0_i32, %c0_i32_0 : i32, i32
  }
  func.func @transform_3(%arg0: i32, %arg1: i32) -> (i32, i32) {
    %c0_i32 = arith.constant 0 : i32
    return %arg0, %arg1 : i32, i32
  }
}

</mosaic_0001>

<bundles_post_ra>
// kernel: bilinear_pallas.1
= control target key start
LH: loop header
LB: loop body
LE: loop exit
PB: predicated region body
PF: predicated region fallthrough
CT: control target
= control target key end

     0   :  { %8 = vsyncpa [#allocation4], 0  ;;  %s347_s0 = inlined_call_operand.hbm [shape: f32[16,32], index: 0, kind: input, shape index: {}, may-alias: {0,1}]   ;;  %s348_s1 = inlined_call_operand.hbm [shape: f32[16,32], index: 1, kind: input, shape index: {}, may-alias: {0,1}]   ;;  %s349_s2 = inlined_call_operand.hbm [shape: f32[32,32], index: 2, kind: input, shape index: {}]   ;;  %s350_s3 = inlined_call_operand.hbm [shape: f32[16,16], index: 3, kind: output, shape index: {}]  }
   0x1   :  { %9 = vsyncpa [#allocation7], 0 }
   0x2   :  { %10 = vsyncpa [#allocation5], 0  ;;  %s28_s14 = sshll.u32 %s348_s1, 4  ;;  %s287_s15 = smov [#allocation6]   ;;  %s29_s14 = int_to_ptr.hbm [resolvable:$true] %s28_s14 }
   0x3   :  { %s30_s16 = sshll.u32 %s287_s15, 4  ;;  %s15_s19 = sshll.u32 %s347_s0, 4  ;;  %s31_s16 = int_to_ptr.vmem [resolvable:$true] %s30_s16  ;;  %s16_s19 = int_to_ptr.hbm [resolvable:$true] %s15_s19 }
   0x4   :  { %s288_s20 = smov 128   ;;  %s289_s21 = smov 8  }
   0x5   :  { %36 = dma.hbm_to_vmem [thread:$0]  %s29_s14, 256, %s31_s16, [#allocation7], %s288_s20, %s288_s20, %s289_s21  }
   0x6   :  { %s290_s22 = smov [#allocation3]   ;;  %s41_s1 = sshll.u32 %s349_s2, 4  ;;  %s42_s1 = int_to_ptr.hbm [resolvable:$true] %s41_s1 }
   0x7   :  { %s17_s23 = sshll.u32 %s290_s22, 4  ;;  %s291_s0 = smov [#allocation8]   ;;  %s18_s23 = int_to_ptr.vmem [resolvable:$true] %s17_s23 }
   0x8   :  { %23 = dma.hbm_to_vmem [thread:$0]  %s16_s19, 256, %s18_s23, [#allocation4], %s288_s20, %s288_s20, %s289_s21  }
   0x9   :  { %s43_s26 = sshll.u32 %s291_s0, 4  ;;  %s44_s26 = int_to_ptr.vmem [resolvable:$true] %s43_s26 }
   0xa   :  { %49 = dma.hbm_to_vmem [thread:$0]  %s42_s1, 512, %s44_s26, [#allocation7], %s288_s20, %s288_s20, %s289_s21  }
   0xb   :  { %281 = dma.done.wait [#allocation4], 256  }
   0xc   :  { %282 = vsyncadd [#allocation4], 4294967040 }
   0xd   :  { %283 = dma.done.wait [#allocation7], 768  }
   0xe   :  { %284 = vsyncadd [#allocation7], 4294966528  ;;  %v71_v0 = vld [vmem:[#allocation8 + $0x18] sm:$0xff]  ;;  %v70_v1 = vld [vmem:[#allocation8 + $0x10] sm:$0xff]  ;;  %vm72_vm0 = vcmask 261120   ;;  %vm144_vm1 = vcmask 130048  }
   0xf   :  { %173 = vmatpush.msra.mxu2 %v71_v0  ;;  %91 = vmatpush.msra.mxu0 %v71_v0  ;;  %v69_v2 = vld [vmem:[#allocation8 + $0x8] sm:$0xff]  ;;  %v68_v3 = vld [vmem:[#allocation8] sm:$0xff]  ;;  %v107_v6 = vld [vmem:[#allocation6 + $0x8] sm:$0xff]  ;;  %s292_s2 = smov [#allocation9]   ;;  %s153_s30 = sshll.u32 %s350_s3, 4  ;;  %s154_s30 = int_to_ptr.hbm [resolvable:$true] %s153_s30 }
  0x10   :  { %v67_v4 = vld [vmem:[#allocation3 + $0x8] sm:$0xff]  ;;  %v66_v5 = vld [vmem:[#allocation3] sm:$0xff]  ;;  %177 = vmatpush.xpose.msk.msra.mxu3 %vm72_vm0, %v107_v6  ;;  %169 = vmatpush.xpose.msk.msra.mxu1 %vm72_vm0, %v107_v6  ;;  %v106_v7 = vld [vmem:[#allocation6] sm:$0xff]  ;;  %s151_s27 = sshll.u32 %s292_s2, 4  ;;  %s152_s27 = int_to_ptr.vmem [resolvable:$true] %s151_s27 }
  0x11   :  { %174 = vmatpush.msra.mxu2 %v70_v1  ;;  %92 = vmatpush.msra.mxu0 %v70_v1 }
  0x13   :  { %175 = vmatpush.msra.mxu2 %v69_v2  ;;  %93 = vmatpush.msra.mxu0 %v69_v2 }
  0x14   :  { %178 = vmatpush.xpose.msk.msra.mxu3 %vm72_vm0, %v106_v7  ;;  %170 = vmatpush.xpose.msk.msra.mxu1 %vm72_vm0, %v106_v7 }
  0x15   :  { %176 = vmatpush.msra.mxu2 %v68_v3  ;;  %94 = vmatpush.msra.mxu0 %v68_v3 }
  0x16   :  { %168 = vmatmul.msk.f32.vlgmr.msra.gmra.mxu2 %vm72_vm0, %v67_v4  ;;  %167 = vmatmul.msk.f32.vlgmr.msra.gmra.mxu0 %vm72_vm0, %v66_v5 }
  0x93   :  { %v96_v8 = vpop.f32.mrf.mxu0 }
  0x94   :  { %102 = vst.msk [vmem:[#allocation2] sm:$0xff] %vm72_vm0, %v96_v8 }
  0x99   :  { %v99_v9 = vpop.f32.mrf.mxu2 }
  0x9a   :  { %103 = vst.msk [vmem:[#allocation2 + $0x8] sm:$0xff] %vm72_vm0, %v99_v9 }
  0x9b   :  { %v104_v10 = vld [vmem:[#allocation2] sm:$0xff] }
  0x9c   :  { %171 = vmatmul.msk.f32.vlgmr.msra.gmra.mxu1 %vm72_vm0, %v104_v10 }
  0xa1   :  { %v105_v11 = vld [vmem:[#allocation2 + $0x8] sm:$0xff] }
  0xa2   :  { %172 = vmatmul.msk.f32.vlgmr.msra.gmra.mxu3 %vm72_vm0, %v105_v11 }
 0x119   :  { %v138_v12 = vpop.f32.mrf.mxu1 }
 0x11a   :  { %145 = vst.msk [vmem:[#allocation9] sm:$0xff] %vm144_vm1, %v138_v12 }
 0x125   :  { %v141_v13 = vpop.f32.mrf.mxu3 }
 0x126   :  { %146 = vst.msk [vmem:[#allocation9 + $0x8] sm:$0xff] %vm144_vm1, %v141_v13 }
 0x127   :  { %159 = dma.vmem_to_hbm [thread:$0]  %s152_s27, 256, %s154_s30, [#allocation5], %s288_s20, %s288_s20, %s289_s21  }
 0x128   :  { %285 = dma.done.wait [#allocation5], 256  }
 0x129   :  { %286 = vsyncadd [#allocation5], 4294967040 }
 0x12a   :  { %164 = vsyncpa [#allocation4], 1 }
 0x12b   :  { %165 = vsyncpa [#allocation7], 1 }
 0x12c   :  { %166 = vsyncpa [#allocation5], 1 }

</bundles_post_ra>
